<compile_context>
chip_gen: v6e
topology: v6e:2x2x1
jax: 0.10.0
libtpu: 0.0.40
codegen_flags: <defaults>
</compile_context>

<pallas_src>
import math

import jax
import jax.numpy as jnp
from jax.experimental import pallas as pl
from jax.experimental.pallas import tpu as pltpu


def nb_forward_kernel(x_ref, w1_ref, b1_ref, w2_ref, b2_ref, o_ref):
    # Cast x to the MXU operand dtype in-kernel (no extra HBM pass in the wrapper).
    x = x_ref[...].astype(w1_ref.dtype)

    # Layer 1: Linear on the MXU, f32 accumulation; bias + ReLU in f32 on the VPU.
    h = jnp.dot(x, w1_ref[...], preferred_element_type=jnp.float32)
    h = jnp.maximum(h + b1_ref[...], 0.0)            # b1 is (1, d_hid), broadcasts over rows

    # Layer 2: Linear (no activation, per OutputModule contract). Match MXU operand dtypes.
    logits = jnp.dot(h.astype(w2_ref.dtype), w2_ref[...],
                     preferred_element_type=jnp.float32)
    logits = logits + b2_ref[...]                     # b2 is (1, d_out)

    # Numerically stable softmax over the feature axis, all elementwise math in f32.
    m = jnp.max(logits, axis=-1, keepdims=True)
    e = jnp.exp(logits - m)
    denom = jnp.sum(e, axis=-1, keepdims=True)
    # Exact normalization (rows must sum to 1 for the NB likelihood); the divide is
    # negligible on this memory-bound kernel.
    o_ref[...] = (e / denom).astype(o_ref.dtype)


def _round_up(n, m):
    return ((n + m - 1) // m) * m


def nb_module_forward(x, w1, b1, w2, b2, *, tb=None,
                      compute_dtype=jnp.bfloat16, out_dtype=jnp.float32):
    """Fused Linear -> ReLU -> Linear -> softmax forward.

    x:  (B, d_in) activations from the decoder (passed to the kernel unmodified).
    w1: (d_in, d_hid), b1: (1, d_hid)   -- first fc layer (transposed vs. PyTorch).
    w2: (d_hid, d_out), b2: (1, d_out)  -- output fc layer.
    tb: batch tile; default targets 8192 rows but is capped at round_up(cdiv(B, 2), 8)
        so v7x's two TensorCores both get grid points whenever B > 8.
    compute_dtype: MXU operand dtype (bf16 default; accumulation is always f32).
    out_dtype: output dtype (f32 default; bf16 halves output HBM traffic).
    """
    B, d_in = x.shape
    d_hid = w1.shape[1]
    d_out = w2.shape[1]

    # Large batch tile (multiple of 8 sublanes) to amortize the ~0.35 us per-grid-step
    # overhead, while keeping >= 2 grid points for v7x megacore when B allows it.
    if tb is None:
        tb = min(8192, _round_up(pl.cdiv(max(B, 1), 2), 8))
    tb = max(8, _round_up(tb, 8))
    grid_b = pl.cdiv(B, tb)

    # Only the tiny weights/biases are cast at the wrapper; x goes in untouched.
    w1_c = w1.astype(compute_dtype)
    w2_c = w2.astype(compute_dtype)
    b1_f = b1.reshape(1, d_hid).astype(jnp.float32)
    b2_f = b2.reshape(1, d_out).astype(jnp.float32)

    out_itemsize = jnp.dtype(out_dtype).itemsize
    cd_itemsize = jnp.dtype(compute_dtype).itemsize

    # Advisory cost estimate so XLA can overlap this memory-bound call with neighbors.
    cost = pl.CostEstimate(
        flops=2 * B * (d_in * d_hid + d_hid * d_out),
        transcendentals=B * d_out,
        bytes_accessed=(x.size * x.dtype.itemsize
                        + B * d_out * out_itemsize
                        + (d_in * d_hid + d_hid * d_out) * cd_itemsize
                        + (d_hid + d_out) * 4),
    )

    # Rough per-core VMEM need: double-buffered x/out tiles + resident weights +
    # in-kernel intermediates (h, logits). Only raise the scoped limit when needed
    # (v5e default is 16 MiB); cap at v7x's 64 MiB physical VMEM.
    est_vmem = (2 * tb * d_in * x.dtype.itemsize
                + 2 * tb * d_out * out_itemsize
                + tb * (d_hid + d_out) * 4
                + (d_in * d_hid + d_hid * d_out) * cd_itemsize
                + (d_hid + d_out) * 4)
    vmem_limit = None
    if est_vmem > 16 * 2 ** 20:
        vmem_limit = int(min(2 * est_vmem, 64 * 2 ** 20))

    # Ragged last tile: Pallas masks the out-of-range rows of the final block (reads are
    # unspecified, stores are dropped); softmax is per-row so garbage never leaks into
    # valid rows. out_shape is exactly (B, d_out) -- no wrapper-side pad/slice.
    return pl.pallas_call(
        nb_forward_kernel,
        out_shape=jax.ShapeDtypeStruct((B, d_out), out_dtype),
        grid_spec=pltpu.PrefetchScalarGridSpec(
            num_scalar_prefetch=0,
            grid=(grid_b,),
            in_specs=[
                pl.BlockSpec((tb, d_in), lambda i: (i, 0)),      # x tile over batch
                pl.BlockSpec((d_in, d_hid), lambda i: (0, 0)),   # W1 (resident in VMEM)
                pl.BlockSpec((1, d_hid), lambda i: (0, 0)),      # b1
                pl.BlockSpec((d_hid, d_out), lambda i: (0, 0)),  # W2 (resident in VMEM)
                pl.BlockSpec((1, d_out), lambda i: (0, 0)),      # b2
            ],
            out_specs=pl.BlockSpec((tb, d_out), lambda i: (i, 0)),
        ),
        compiler_params=pltpu.CompilerParams(
            # Batch axis is embarrassingly parallel -> megacore sharding on v7x.
            dimension_semantics=("parallel",),
            vmem_limit_bytes=vmem_limit,
        ),
        cost_estimate=cost,
    )(x, w1_c, b1_f, w2_c, b2_f)


def nb_module_forward_ref(x, w1, b1, w2, b2):
    h = jnp.maximum(x @ w1 + b1, 0.0)
    logits = h @ w2 + b2
    return jax.nn.softmax(logits, axis=-1)


if __name__ == "__main__":
    # Small shapes consistent with the module: batch=10 (deliberately not a multiple of 8
    # to exercise the ragged-tile masking path), decoder hidden=32, fc intermediate=64,
    # out_features (n_genes)=16.
    B, D_IN, D_HID, D_OUT = 10, 32, 64, 16
    r_init = 2

    key = jax.random.PRNGKey(0)
    kx, kw1, kb1, kw2, kb2 = jax.random.split(key, 5)

    # Deterministic parameter init (PyTorch-Linear-style uniform bounds).
    lim1 = 1.0 / math.sqrt(D_IN)
    lim2 = 1.0 / math.sqrt(D_HID)
    x = jax.random.normal(kx, (B, D_IN), dtype=jnp.float32)
    w1 = jax.random.uniform(kw1, (D_IN, D_HID), jnp.float32, -lim1, lim1)
    b1 = jax.random.uniform(kb1, (1, D_HID), jnp.float32, -lim1, lim1)
    w2 = jax.random.uniform(kw2, (D_HID, D_OUT), jnp.float32, -lim2, lim2)
    b2 = jax.random.uniform(kb2, (1, D_OUT), jnp.float32, -lim2, lim2)

    # log_r dispersion parameter (unused in forward, kept for module fidelity).
    log_r = jnp.full((1, D_OUT), math.log(r_init - 1), dtype=jnp.float32)
    dispersion = jnp.exp(log_r) + 1.0  # == r, used by loss/log_prob outside this kernel

    ref = nb_module_forward_ref(x, w1, b1, w2, b2)

    # f32 operand path (near bit-faithful).
    out_f32 = nb_module_forward(x, w1, b1, w2, b2, compute_dtype=jnp.float32)
    # bf16 operand / f32 accumulate path (production / performance configuration).
    out_bf16 = nb_module_forward(x, w1, b1, w2, b2)
    # bf16 output path (reduced output HBM traffic).
    out_bf16o = nb_module_forward(x, w1, b1, w2, b2, out_dtype=jnp.bfloat16)
    out_f32, out_bf16, out_bf16o = jax.block_until_ready((out_f32, out_bf16, out_bf16o))

    assert out_f32.shape == (B, D_OUT) and out_bf16.shape == (B, D_OUT)
    assert out_bf16o.dtype == jnp.bfloat16
    assert jnp.allclose(out_f32, ref, atol=2e-3, rtol=2e-3)
    assert jnp.allclose(out_bf16, ref, atol=2e-2, rtol=2e-2)
    assert jnp.allclose(out_bf16o.astype(jnp.float32), ref, atol=3e-2, rtol=3e-2)
    # softmax rows sum to 1 (exact normalization in the kernel, up to output rounding)
    assert jnp.allclose(jnp.sum(out_f32, axis=-1), jnp.ones((B,)), atol=1e-4)
    assert jnp.allclose(jnp.sum(out_bf16, axis=-1), jnp.ones((B,)), atol=1e-3)

    print("KERNEL_OK")
</pallas_src>

<mosaic_0001>
module attributes {stable_mosaic.version = 11 : i64} {
  func.func @nb_forward_kernel(%arg0: i32, %arg1: memref<8x32xf32, #tpu.memory_space<vmem>>, %arg2: memref<32x64xf32, #tpu.memory_space<vmem>>, %arg3: memref<1x64xf32, #tpu.memory_space<vmem>>, %arg4: memref<64x16xf32, #tpu.memory_space<vmem>>, %arg5: memref<1x16xf32, #tpu.memory_space<vmem>>, %arg6: memref<8x16xf32, #tpu.memory_space<vmem>>) attributes {dimension_semantics = [#tpu.dimension_semantics<parallel>], iteration_bounds = array<i64: 2>, scalar_prefetch = 0 : i64, scratch_operands = 0 : i64, tpu.core_type = #tpu.core_type<tc>, window_params = [{transform_indices = @transform_0, window_bounds = array<i64: 8, 32>}, {pipeline_mode = #tpu.pipeline_mode<synchronous>, transform_indices = @transform_1, window_bounds = array<i64: 32, 64>}, {pipeline_mode = #tpu.pipeline_mode<synchronous>, transform_indices = @transform_2, window_bounds = array<i64: 1, 64>}, {pipeline_mode = #tpu.pipeline_mode<synchronous>, transform_indices = @transform_3, window_bounds = array<i64: 64, 16>}, {pipeline_mode = #tpu.pipeline_mode<synchronous>, transform_indices = @transform_4, window_bounds = array<i64: 1, 16>}, {transform_indices = @transform_5, window_bounds = array<i64: 8, 16>}]} {
    %c0 = arith.constant 0 : index
    %c0_0 = arith.constant 0 : index
    %0 = vector.load %arg1[%c0, %c0_0] : memref<8x32xf32, #tpu.memory_space<vmem>>, vector<8x32xf32>
    %c0_1 = arith.constant 0 : index
    %c0_2 = arith.constant 0 : index
    %1 = vector.load %arg2[%c0_1, %c0_2] : memref<32x64xf32, #tpu.memory_space<vmem>>, vector<32x64xf32>
    %cst = arith.constant dense<0.000000e+00> : vector<8x64xf32>
    %2 = tpu.matmul %0, %1, %cst {dimension_numbers = #tpu.dot_dimension_numbers<[1], [0], [0], [1], [0, 0, 1, 1], [], []>} : vector<8x32xf32>, vector<32x64xf32>, vector<8x64xf32> -> vector<8x64xf32>
    %c0_3 = arith.constant 0 : index
    %c0_4 = arith.constant 0 : index
    %3 = vector.load %arg3[%c0_3, %c0_4] : memref<1x64xf32, #tpu.memory_space<vmem>>, vector<1x64xf32>
    %4 = vector.broadcast %3 : vector<1x64xf32> to vector<8x64xf32>
    %5 = arith.addf %2, %4 : vector<8x64xf32>
    %cst_5 = arith.constant 0.000000e+00 : f32
    %6 = vector.broadcast %cst_5 : f32 to vector<8x64xf32>
    %7 = arith.maximumf %5, %6 : vector<8x64xf32>
    %c0_6 = arith.constant 0 : index
    %c0_7 = arith.constant 0 : index
    %8 = vector.load %arg4[%c0_6, %c0_7] : memref<64x16xf32, #tpu.memory_space<vmem>>, vector<64x16xf32>
    %cst_8 = arith.constant dense<0.000000e+00> : vector<8x16xf32>
    %9 = tpu.matmul %7, %8, %cst_8 {dimension_numbers = #tpu.dot_dimension_numbers<[1], [0], [0], [1], [0, 0, 1, 1], [], []>} : vector<8x64xf32>, vector<64x16xf32>, vector<8x16xf32> -> vector<8x16xf32>
    %c0_9 = arith.constant 0 : index
    %c0_10 = arith.constant 0 : index
    %10 = vector.load %arg5[%c0_9, %c0_10] : memref<1x16xf32, #tpu.memory_space<vmem>>, vector<1x16xf32>
    %11 = vector.broadcast %10 : vector<1x16xf32> to vector<8x16xf32>
    %12 = arith.addf %9, %11 : vector<8x16xf32>
    %cst_11 = arith.constant dense<0xFF800000> : vector<8xf32>
    %13 = vector.multi_reduction <maximumf>, %12, %cst_11 [1] : vector<8x16xf32> to vector<8xf32>
    %14 = vector.shape_cast %13 : vector<8xf32> to vector<8x1xf32>
    %15 = vector.broadcast %14 : vector<8x1xf32> to vector<8x16xf32>
    %16 = arith.subf %12, %15 : vector<8x16xf32>
    %17 = math.exp %16 : vector<8x16xf32>
    %cst_12 = arith.constant dense<0.000000e+00> : vector<8xf32>
    %18 = vector.multi_reduction <add>, %17, %cst_12 [1] : vector<8x16xf32> to vector<8xf32>
    %19 = vector.shape_cast %18 : vector<8xf32> to vector<8x1xf32>
    %20 = vector.broadcast %19 : vector<8x1xf32> to vector<8x16xf32>
    %21 = arith.divf %17, %20 : vector<8x16xf32>
    %c0_13 = arith.constant 0 : index
    %c0_14 = arith.constant 0 : index
    %22 = vector.load %arg6[%c0_13, %c0_14] : memref<8x16xf32, #tpu.memory_space<vmem>>, vector<8x16xf32>
    tpu.vector_store %arg6[%c0_13, %c0_14], %21 {strides = array<i32>} : memref<8x16xf32, #tpu.memory_space<vmem>>, vector<8x16xf32>,
    return
  }
  func.func @transform_0(%arg0: i32) -> (i32, i32) {
    %c0_i32 = arith.constant 0 : i32
    %c0_i32_0 = arith.constant 0 : i32
    return %arg0, %c0_i32 : i32, i32
  }
  func.func @transform_1(%arg0: i32) -> (i32, i32) {
    %c0_i32 = arith.constant 0 : i32
    %c0_i32_0 = arith.constant 0 : i32
    %c0_i32_1 = arith.constant 0 : i32
    return %c0_i32, %c0_i32_0 : i32, i32
  }
  func.func @transform_2(%arg0: i32) -> (i32, i32) {
    %c0_i32 = arith.constant 0 : i32
    %c0_i32_0 = arith.constant 0 : i32
    %c0_i32_1 = arith.constant 0 : i32
    return %c0_i32, %c0_i32_0 : i32, i32
  }
  func.func @transform_3(%arg0: i32) -> (i32, i32) {
    %c0_i32 = arith.constant 0 : i32
    %c0_i32_0 = arith.constant 0 : i32
    %c0_i32_1 = arith.constant 0 : i32
    return %c0_i32, %c0_i32_0 : i32, i32
  }
  func.func @transform_4(%arg0: i32) -> (i32, i32) {
    %c0_i32 = arith.constant 0 : i32
    %c0_i32_0 = arith.constant 0 : i32
    %c0_i32_1 = arith.constant 0 : i32
    return %c0_i32, %c0_i32_0 : i32, i32
  }
  func.func @transform_5(%arg0: i32) -> (i32, i32) {
    %c0_i32 = arith.constant 0 : i32
    %c0_i32_0 = arith.constant 0 : i32
    return %arg0, %c0_i32 : i32, i32
  }
}

</mosaic_0001>

<bundles_post_ra>
// kernel: tpu_custom_call.1
= control target key start
LH: loop header
LB: loop body
LE: loop exit
PB: predicated region body
PF: predicated region fallthrough
CT: control target
= control target key end

     0   :  { %10 = vsyncpa [#allocation3], 0  ;;  %s814_s0 = inlined_call_operand.vmem [shape: f32[10,32], index: 0, kind: input, shape index: {}]   ;;  %s815_s1 = inlined_call_operand.vmem [shape: f32[32,64], index: 1, kind: input, shape index: {}]   ;;  %s816_s2 = inlined_call_operand.vmem [shape: f32[1,64], index: 2, kind: input, shape index: {}]   ;;  %s817_s3 = inlined_call_operand.vmem [shape: f32[64,16], index: 3, kind: input, shape index: {}]   ;;  %s818_s4 = inlined_call_operand.vmem [shape: f32[1,16], index: 4, kind: input, shape index: {}]   ;;  %s819_s5 = inlined_call_operand.hbm [shape: f32[10,16], index: 5, kind: output, shape index: {}]  }
   0x1   :  { %12 = vsyncpa [#allocation3 + $0x1], 0  ;;  %s680_s18 = smov 0   ;;  %s682_s19 = smov 0  }
   0x2   :  { %s684_s20 = smov 0   ;;  %s686_s21 = smov 0  }
   0x3 LB: > { %s701_s22 = sadd.s32 4294967295, %s645_s21   ;;  %s482_s23 = sadd.s32 4294967294, %s645_s21   ;;  %s645_s21 = sphi %s686_s21, %s825_s21   ;;  %s641_s20 = sphi %s684_s20, %s824_s20   ;;  %s637_s19 = sphi %s682_s19, %s823_s19   ;;  %s633_s18 = sphi %s680_s18, %s822_s18  }
   0x4   : > { %s705_s24 = sadd.s32 1, %s645_s21   ;;  %s135_s25 = sadd.s32 1, %s641_s20 }
   0x5   : > { %s132_s26 = ssub.s32 %s645_s21, %s705_s24  ;;  %p145_p0 = scmp.ne.s32.totalorder %s641_s20, %s637_s19 }
   0x6   : > { %p133_p1 = scmp.eq.s32.totalorder %s132_s26, 0  ;;  %p146_p2 = scmp.eq.s32.totalorder %s701_s22, 1 }
   0x7   : > { %p151_p3 = scmp.ne.s32.totalorder %s637_s19, %s633_s18  ;;  %p152_p4 = scmp.eq.s32.totalorder %s482_s23, 1 }
   0x8   : > { %s716_s27 = scalar_select %p133_p1, %s641_s20, %s135_s25  }
   0x9   : > { %p718_p5 = por %p146_p2, %p145_p0  ;;  %p722_p6 = por %p152_p4, %p151_p3 }
   0xa   : > { %p485_p7 = scmp.ge.s32.totalorder %s645_s21, 1  ;;  %p189_p8 = scmp.lt.s32.totalorder %s645_s21, 3 }
   0xc   : > { %p190_p9 = pnand %p485_p7, %p189_p8 }
   0xd   : > { %p216_p10 = scmp.lt.s32.totalorder (!%p190_p9), %s701_s22, 1  ;;  %s213_s6 = sand.u32 (!%p190_p9), 1, %s637_s19  }
   0xe   : > { %193 = sbr.rel (%p190_p9) target bundleno = 745 (0x2e9), region = 40  ;;  %s493_s8 = sshll.u32 (!%p190_p9), %s701_s22, 7 }
   0xf   : > { %s421_s13 = scalar_lea.hbm (!%p190_p9), %s819_s5, %s493_s8  ;;  %s410_s14 = scalar_lea.sflag (!%p190_p9), [#allocation3], %s213_s6 }
  0x13   : > { %v224_v0 = vld [vmem:[%s815_s1 + $0x18] sm:$0xff]  ;;  %v647_v1 = vmov 0.0   ;;  %v223_v2 = vld [vmem:[%s815_s1 + $0x10] sm:$0xff]  ;;  %vm648_vm0 = vmmov 0   ;;  %s217_s11 = scalar_select %p216_p10, %s701_s22, 1  ;;  %v222_v5 = vld [vmem:[%s815_s1 + $0x8] sm:$0xff] }
  0x14   : > { %510 = vmatprep.subr.mxu0 %v647_v1  ;;  %518 = vmatprep.mubr.msk.f32.mxu0 %vm648_vm0, %v647_v1  ;;  %v314_v3 = vld [vmem:[%s817_s3 + $0x38] sm:$0xff]  ;;  %v313_v4 = vld [vmem:[%s817_s3 + $0x30] sm:$0xff]  ;;  %v312_v6 = vld [vmem:[%s817_s3 + $0x28] sm:$0xff]  ;;  %vm232_vm1 = vcmask 261120   ;;  %vm322_vm2 = vcmask 523264   ;;  %vm396_vm3 = vcmask 130048  }
  0x15   : > { %511 = vmatpush3.msra.mxu0 %v224_v0  ;;  %521 = vmatprep.subr.mxu1 %v647_v1  ;;  %s487_s16 = sshll.u32 %s217_s11, 3  ;;  %v221_v7 = vld [vmem:[%s815_s1] sm:$0xff]  ;;  %v310_v10 = vld [vmem:[%s817_s3 + $0x18] sm:$0xff]  ;;  %v309_v11 = vld [vmem:[%s817_s3 + $0x10] sm:$0xff] }
  0x16   : > { %512 = vmatprep.subr.mxu0 %v647_v1  ;;  %522 = vmatpush3.msra.mxu1 %v314_v3  ;;  %s219_s7 = scalar_lea.vmem %s814_s0, %s487_s16  ;;  %v311_v9 = vld [vmem:[%s817_s3 + $0x20] sm:$0xff]  ;;  %v308_v12 = vld [vmem:[%s817_s3 + $0x8] sm:$0xff]  ;;  %s649_s16 = smov [#allocation2]  }
  0x17   : > { %513 = vmatpush3.msra.mxu0 %v223_v2  ;;  %523 = vmatprep.subr.mxu1 %v647_v1  ;;  %v220_v8 = vld [vmem:[%s219_s7] sm:$0xff]  ;;  %s486_s7 = sshll.u32 %s213_s6, 3  ;;  %s589_s17 = sshll.u32 %s649_s16, 4  ;;  %s590_s17 = int_to_ptr.vmem [resolvable:$false] %s589_s17 }
  0x18   : > { %514 = vmatprep.subr.mxu0 %v647_v1  ;;  %524 = vmatpush3.msra.mxu1 %v313_v4  ;;  %v307_v13 = vld [vmem:[%s817_s3] sm:$0xff]  ;;  %s215_s9 = scalar_lea.vmem [#allocation2], %s486_s7  ;;  %s591_s22 = scalar_lea.vmem %s590_s17, 256 }
  0x19   : > { %515 = vmatpush3.msra.mxu0 %v222_v5  ;;  %525 = vmatprep.subr.mxu1 %v647_v1  ;;  %v488_v14 = vld [vmem:[%s816_s2] ss:$0 sm:$0xff]  ;;  %s423_s10 = sshll.u32 %s215_s9, 4  ;;  %s424_s10 = int_to_ptr.vmem [resolvable:$true] %s423_s10 }
  0x1a   : > { %516 = vmatprep.subr.mxu0 %v647_v1  ;;  %526 = vmatpush3.msra.mxu1 %v312_v6  ;;  %v490_v19 = vld [vmem:[%s818_s4] ss:$0 sm:$0xff]  ;;  %s585_s15 = scalar_lea.vmem %s424_s10, 128  ;;  %p592_p0 = scmp.lt.s32.totalorder %s424_s10, %s590_s17 }
  0x1b   : > { %517 = vmatpush3.msra.mxu0 %v221_v7  ;;  %527 = vmatprep.subr.mxu1 %v647_v1  ;;  %p586_p11 = scmp.ne.s32.totalorder %s424_s10, %s585_s15  ;;  %p593_p1 = scmp.lt.s32.totalorder %s591_s22, %s585_s15 }
  0x1c   : > { %519 = vmatmul.mubr.msk.f32.vlgmr.msra.gmra.mxu0 %vm232_vm1, %v220_v8  ;;  %528 = vmatpush3.msra.mxu1 %v311_v9 }
  0x1d   : > { %529 = vmatprep.subr.mxu1 %v647_v1  ;;  %537 = vmatprep.mubr.msk.f32.mxu1 %vm648_vm0, %v647_v1  ;;  %p587_p12 = pnand %p586_p11, %p718_p5  ;;  %p594_p2 = por %p593_p1, %p592_p0 }
  0x1e   : > { %530 = vmatpush3.msra.mxu1 %v310_v10 }
  0x1f   : > { %531 = vmatprep.subr.mxu1 %v647_v1  ;;  %p588_p13 = pneg %p587_p12 }
  0x20   : > { %532 = vmatpush3.msra.mxu1 %v309_v11 }
  0x21   : > { %533 = vmatprep.subr.mxu1 %v647_v1  ;;  %p595_p3 = pnand %p594_p2, %p588_p13 }
  0x22   : > { %534 = vmatpush3.msra.mxu1 %v308_v12 }
  0x23   : > { %535 = vmatprep.subr.mxu1 %v647_v1 }
  0x24   : > { %536 = vmatpush3.msra.mxu1 %v307_v13 }
  0xdc   : > { %v302_v15 = vpop.f32.mrf.mxu0 }
  0xdd   : > { %v303_v16 = vadd.f32 %v488_v14, %v302_v15 }
  0xde   : > { %v520_v17 = vpop.f32.mrf.mxu0 }
  0xdf   : > { %v306_v18 = vmax.f32 %v303_v16, 0.0 }
  0xe1   : > { %538 = vmatmul.mubr.msk.f32.vlgmr.msra.gmra.mxu1 %vm322_vm2, %v306_v18 }
 0x1a1   : > { %v392_v20 = vpop.f32.mrf.mxu1 }
 0x1a2   : > { %v393_v21 = vadd.f32 %v490_v19, %v392_v20 }
 0x1a3   : > { %v539_v22 = vpop.f32.mrf.mxu1 }
 0x1a4   : > { %v397_v23 = vsel %vm396_vm3, %v393_v21, -inf }
 0x1a5   : > { %398 = vmax.xlane.f32.xlu0 %v397_v23 }
 0x22e   : > { %v399_v24 = vpop.xlane.xlu0 %398 }
 0x22f   : > { %v400_v25 = vsub.f32 %v393_v21, %v399_v24 }
 0x231   : > { %v401_v26 = vmul.f32 1.442695, %v400_v25 }
 0x233   : > { %581 = vpow2.f32 %v401_v26 }
 0x240   : > { %v582_v27 = vpop.eup %581 }
 0x241   : > { %v403_v28 = vsel %vm396_vm3, %v582_v27, 0.0 }
 0x242   : > { %404 = vadd.xlane.f32.xlu0 %v403_v28 }
 0x2cb   : > { %v405_v29 = vpop.xlane.xlu0 %404 }
 0x2cc   : > { %583 = vrcp.f32 %v405_v29 }
 0x2d9   : > { %v584_v30 = vpop.eup %583 }
 0x2da   : > { %v407_v31 = vmul.f32 %v584_v30, %v582_v27 }
 0x2dc   : > { %408 = vst.msk [vmem:[%s215_s9] sm:$0xff] %vm396_vm3, %v407_v31 }
 0x2dd   : > { %598 = shalt.err (!%p595_p3)
}
 0x2de   : > { %s599_s23 = scalar_lea.hbm %s421_s13, 128  ;;  %s603_s30 = scalar_lea.hbm %s819_s5, 256 }
 0x2df   : > { %p600_p4 = scmp.ne.s32.totalorder %s421_s13, %s599_s23  ;;  %p604_p9 = scmp.lt.s32.totalorder %s421_s13, %s819_s5 }
 0x2e0   : > { %p605_p10 = scmp.lt.s32.totalorder %s603_s30, %s599_s23 }
 0x2e1   : > { %p601_p7 = pnand %p600_p4, %p718_p5 }
 0x2e2   : > { %p606_p11 = por %p605_p10, %p604_p9 }
 0x2e3   : > { %p602_p8 = pneg %p601_p7 }
 0x2e5   : > { %p607_p12 = pnand %p606_p11, %p602_p8 }
 0x2e7   : > { %610 = shalt.err (!%p607_p12)
}
 0x2e8   : > { %540 = dma.vmem_to_hbm [thread:$0]  (%p718_p5), %s424_s10, 128, %s421_s13, %s410_s14  }
 0x2e9 PF: > { %p546_p13 = scmp.ge.s32.totalorder %s645_s21, 2  ;;  %s435_s8 = sand.u32 1, %s633_s18  }
 0x2ea   : > { %s436_s9 = scalar_lea.sflag [#allocation3], %s435_s8 }
 0x2eb   : > { %p543_p0 = pnand %p546_p13, %p722_p6 }
 0x2ed   : > { %p544_p1 = pneg %p543_p0 }
 0x2ef   : > { %628 = dma.done.wait (%p544_p1), %s436_s9, 128  }
 0x2f0   : > { %630 = vsyncadd (%p544_p1), %s436_s9, 4294967168  ;;  %p15_p2 = scmp.ge.s32.totalorder %s705_s24, 4   ;;  %s822_s18 = smov %s637_s19 }
 0x2f1   : > { %s823_s19 = smov %s641_s20  ;;  %s824_s20 = smov %s716_s27 }
 0x2f2   : > { %s825_s21 = smov %s705_s24  ;;  %17 = sbr.rel (!%p15_p2) target bundleno = 3 (0x3), region = 75 }
 0x2f7   :  { %441 = vsyncpa [#allocation3], 1 }
 0x2f8   :  { %443 = vsyncpa [#allocation3 + $0x1], 1 }

</bundles_post_ra>
